<compile_context>
chip_gen: v7x
topology: tpu7x:2x2x1
jax: 0.10.0
libtpu: 0.0.40
codegen_flags: <defaults>
</compile_context>

<pallas_src>
import functools

import jax
import jax.numpy as jnp
import numpy as np
from jax.experimental import pallas as pl
from jax.experimental.pallas import tpu as pltpu


# ---------------------------------------------------------------------------
# Pallas kernel: latent->h0 linear, unrolled single-tanh LSTM recurrence, then
# ONE output projection + ONE lane-dense, tile-aligned store.
# ---------------------------------------------------------------------------
def decoder_kernel(latent_ref,   # (Bp, L)
                   wl2h_t_ref,   # (L, H)       latent_to_hidden weight^T
                   bl2h_ref,     # (1, H)
                   whh_s_t_ref,  # (H, 4H)      W_hh^T, i/f/o columns pre-scaled 0.5
                   bg_s_ref,     # (1, 4H)      b_ih + b_hh, i/f/o pre-scaled 0.5
                   gsc_ref,      # (1, 4H)      post-tanh scale  [.5,.5,1,.5] per H
                   gof_ref,      # (1, 4H)      post-tanh offset [.5,.5,0,.5] per H
                   wout_t_ref,   # (H, Opad)    output weight^T, zero-padded lanes
                   bout_ref,     # (1, Opad)    output bias, zero-padded lanes
                   out_ref):     # (T*Bp, Opad) time-major hidden projections
    B = latent_ref.shape[0]
    H = wl2h_t_ref.shape[1]
    T = out_ref.shape[0] // B

    # Initial hidden state: latent_to_hidden(latent); cell state = zeros.
    h = (jnp.dot(latent_ref[...], wl2h_t_ref[...],
                 preferred_element_type=jnp.float32) + bl2h_ref[...])
    c = jnp.zeros_like(h)

    # Loop-invariant RHS read once; Mosaic keeps it staged for the MXU across
    # the statically-unrolled jnp.dot calls below.
    whh_s_t = whh_s_t_ref[...]
    # Hoisted broadcasts (broadcast_in_dim is not CSE'd by JAX).
    bg_b = jnp.broadcast_to(bg_s_ref[...], (B, 4 * H))
    gsc_b = jnp.broadcast_to(gsc_ref[...], (B, 4 * H))
    gof_b = jnp.broadcast_to(gof_ref[...], (B, 4 * H))

    # LSTM with zero inputs -> gate preactivation = h @ W_hh^T + (b_ih + b_hh).
    # PyTorch gate order: i, f, g, o.  i/f/o columns arrive pre-scaled by 0.5,
    # so sigmoid(x) = 0.5*tanh(x/2) + 0.5 is one full-width tanh + one FMA;
    # the g slice (scale 1, offset 0) is the plain tanh.
    hs = []
    for _ in range(T):
        pre = jnp.dot(h, whh_s_t, preferred_element_type=jnp.float32) + bg_b
        th = jnp.tanh(pre)            # single full-width EUP pass over (B, 4H)
        acts = gsc_b * th + gof_b     # single full-width VPU FMA
        i_g = acts[:, 0 * H:1 * H]
        f_g = acts[:, 1 * H:2 * H]
        g_g = acts[:, 2 * H:3 * H]
        o_g = acts[:, 3 * H:4 * H]
        c = f_g * c + i_g * g_g
        h = o_g * jnp.tanh(c)
        hs.append(h)                  # stays in vregs; no VMEM scratch store

    # Single batched output projection + single unmasked, tile-aligned store.
    h_all = jnp.concatenate(hs, axis=0)                     # (T*Bp, H), time-major
    y = (jnp.dot(h_all, wout_t_ref[...],
                 preferred_element_type=jnp.float32) + bout_ref[...])
    out_ref[...] = y.astype(out_ref.dtype)


# ---------------------------------------------------------------------------
# Wrapper
# ---------------------------------------------------------------------------
@functools.partial(jax.jit, static_argnames=("max_length",))
def decoder_forward(latent, params, max_length):
    B, L = latent.shape
    H = params["wl2h"].shape[0]
    O = params["wout"].shape[0]
    O_pad = pl.cdiv(O, 128) * 128          # lane-dense output width
    B_pad = pl.cdiv(B, 8) * 8              # sublane-aligned batch

    # Pad batch to a multiple of 8 sublanes (padded rows compute finite junk
    # from the zero latent and are sliced off below).
    latent_p = jnp.zeros((B_pad, L), jnp.float32).at[:B].set(latent)

    # Transpose weights once (glue) so the kernel does row-major matmuls.
    wl2h_t = params["wl2h"].T                                  # (L, H)
    bl2h = params["bl2h"].reshape(1, H)                        # (1, H)

    # Gate pre-scale: 0.5 for i/f/o columns (sigmoid-as-tanh), 1.0 for g.
    gate_scale = jnp.concatenate([
        jnp.full((H,), 0.5, jnp.float32), jnp.full((H,), 0.5, jnp.float32),
        jnp.ones((H,), jnp.float32), jnp.full((H,), 0.5, jnp.float32)])
    gate_offset = jnp.concatenate([
        jnp.full((H,), 0.5, jnp.float32), jnp.full((H,), 0.5, jnp.float32),
        jnp.zeros((H,), jnp.float32), jnp.full((H,), 0.5, jnp.float32)])

    whh_s_t = params["whh"].T * gate_scale[None, :]            # (H, 4H)
    bg_s = ((params["bih"] + params["bhh"]) * gate_scale).reshape(1, 4 * H)
    gsc = gate_scale.reshape(1, 4 * H)
    gof = gate_offset.reshape(1, 4 * H)

    # Zero-pad output projection to 128 lanes so the kernel's final store is a
    # single unmasked full-lane store; padded columns are exactly zero and get
    # sliced off below, so they never leak into the result.
    wout_t = jnp.zeros((H, O_pad), jnp.float32).at[:, :O].set(params["wout"].T)
    bout = jnp.zeros((1, O_pad), jnp.float32).at[:, :O].set(
        params["bout"].reshape(1, O))

    vmem = pl.BlockSpec(memory_space=pltpu.MemorySpace.VMEM)
    out = pl.pallas_call(
        decoder_kernel,
        out_shape=jax.ShapeDtypeStruct((max_length * B_pad, O_pad), jnp.float32),
        in_specs=[vmem] * 9,
        out_specs=vmem,
    )(latent_p, wl2h_t, bl2h, whh_s_t, bg_s, gsc, gof, wout_t, bout)

    # Time-major (T*Bp, O_pad) -> batch-first (B, T, O). Pure XLA glue.
    return out.reshape(max_length, B_pad, O_pad).transpose(1, 0, 2)[:B, :, :O]


# ---------------------------------------------------------------------------
# Pure-JAX reference (mirrors PyTorch nn.LSTM math) for validation.
# ---------------------------------------------------------------------------
def decoder_reference(latent, params, max_length):
    H = params["wl2h"].shape[0]
    h = latent @ params["wl2h"].T + params["bl2h"]
    c = jnp.zeros_like(h)
    bg = params["bih"] + params["bhh"]
    outs = []
    for _ in range(max_length):
        gates = h @ params["whh"].T + bg          # x_t = 0 -> W_ih term vanishes
        i_g = jax.nn.sigmoid(gates[:, 0 * H:1 * H])
        f_g = jax.nn.sigmoid(gates[:, 1 * H:2 * H])
        g_g = jnp.tanh(gates[:, 2 * H:3 * H])
        o_g = jax.nn.sigmoid(gates[:, 3 * H:4 * H])
        c = f_g * c + i_g * g_g
        h = o_g * jnp.tanh(c)
        outs.append(h @ params["wout"].T + params["bout"])
    return jnp.stack(outs, axis=1)


# ---------------------------------------------------------------------------
# Deterministic parameter init (PyTorch shapes from Decoder.__init__)
# ---------------------------------------------------------------------------
def init_params(key, latent_size, hidden_size, output_size):
    ks = jax.random.split(key, 8)

    def unif(k, shape, fan):
        bound = 1.0 / np.sqrt(fan)
        return jax.random.uniform(k, shape, jnp.float32, -bound, bound)

    return {
        # latent_to_hidden: nn.Linear(latent_size, hidden_size)
        "wl2h": unif(ks[0], (hidden_size, latent_size), latent_size),
        "bl2h": unif(ks[1], (hidden_size,), latent_size),
        # lstm: nn.LSTM(output_size, hidden_size, 1) -> W_ih (4H, O), W_hh (4H, H)
        "wih": unif(ks[2], (4 * hidden_size, output_size), hidden_size),
        "whh": unif(ks[3], (4 * hidden_size, hidden_size), hidden_size),
        "bih": unif(ks[4], (4 * hidden_size,), hidden_size),
        "bhh": unif(ks[5], (4 * hidden_size,), hidden_size),
        # output_layer: nn.Linear(hidden_size, output_size)
        "wout": unif(ks[6], (output_size, hidden_size), hidden_size),
        "bout": unif(ks[7], (output_size,), hidden_size),
    }


if __name__ == "__main__":
    latent_size, hidden_size, output_size, max_length = 16, 32, 3, 15
    batch = 2

    key = jax.random.PRNGKey(0)
    k_lat, k_par = jax.random.split(key)
    latent = jax.random.normal(k_lat, (batch, latent_size), jnp.float32)
    params = init_params(k_par, latent_size, hidden_size, output_size)

    out = decoder_forward(latent, params, max_length)
    out = jax.block_until_ready(out)

    ref = decoder_reference(latent, params, max_length)
    assert out.shape == (batch, max_length, output_size)
    np.testing.assert_allclose(np.asarray(out), np.asarray(ref),
                               rtol=1e-5, atol=1e-5)
    print("KERNEL_OK")
</pallas_src>

<mosaic_0001>
module attributes {stable_mosaic.version = 11 : i64} {
  func.func @decoder_kernel(%arg0: memref<8x16xf32, #tpu.memory_space<vmem>>, %arg1: memref<16x32xf32, #tpu.memory_space<vmem>>, %arg2: memref<1x32xf32, #tpu.memory_space<vmem>>, %arg3: memref<32x128xf32, #tpu.memory_space<vmem>>, %arg4: memref<1x128xf32, #tpu.memory_space<vmem>>, %arg5: memref<1x128xf32, #tpu.memory_space<vmem>>, %arg6: memref<1x128xf32, #tpu.memory_space<vmem>>, %arg7: memref<32x128xf32, #tpu.memory_space<vmem>>, %arg8: memref<1x128xf32, #tpu.memory_space<vmem>>, %arg9: memref<120x128xf32, #tpu.memory_space<vmem>>) attributes {dimension_semantics = [], scalar_prefetch = 0 : i64, scratch_operands = 0 : i64, tpu.core_type = #tpu.core_type<tc>} {
    %c0 = arith.constant 0 : index
    %c0_0 = arith.constant 0 : index
    %0 = vector.load %arg0[%c0, %c0_0] : memref<8x16xf32, #tpu.memory_space<vmem>>, vector<8x16xf32>
    %c0_1 = arith.constant 0 : index
    %c0_2 = arith.constant 0 : index
    %1 = vector.load %arg1[%c0_1, %c0_2] : memref<16x32xf32, #tpu.memory_space<vmem>>, vector<16x32xf32>
    %cst = arith.constant dense<0.000000e+00> : vector<8x32xf32>
    %2 = tpu.matmul %0, %1, %cst {dimension_numbers = #tpu.dot_dimension_numbers<[1], [0], [0], [1], [0, 0, 1, 1], [], []>} : vector<8x16xf32>, vector<16x32xf32>, vector<8x32xf32> -> vector<8x32xf32>
    %c0_3 = arith.constant 0 : index
    %c0_4 = arith.constant 0 : index
    %3 = vector.load %arg2[%c0_3, %c0_4] : memref<1x32xf32, #tpu.memory_space<vmem>>, vector<1x32xf32>
    %4 = vector.broadcast %3 : vector<1x32xf32> to vector<8x32xf32>
    %5 = arith.addf %2, %4 : vector<8x32xf32>
    %cst_5 = arith.constant 0.000000e+00 : f32
    %6 = vector.broadcast %cst_5 : f32 to vector<8x32xf32>
    %c0_6 = arith.constant 0 : index
    %c0_7 = arith.constant 0 : index
    %7 = vector.load %arg3[%c0_6, %c0_7] : memref<32x128xf32, #tpu.memory_space<vmem>>, vector<32x128xf32>
    %c0_8 = arith.constant 0 : index
    %c0_9 = arith.constant 0 : index
    %8 = vector.load %arg4[%c0_8, %c0_9] : memref<1x128xf32, #tpu.memory_space<vmem>>, vector<1x128xf32>
    %9 = vector.shape_cast %8 : vector<1x128xf32> to vector<1x128xf32>
    %10 = vector.broadcast %9 : vector<1x128xf32> to vector<8x128xf32>
    %c0_10 = arith.constant 0 : index
    %c0_11 = arith.constant 0 : index
    %11 = vector.load %arg5[%c0_10, %c0_11] : memref<1x128xf32, #tpu.memory_space<vmem>>, vector<1x128xf32>
    %12 = vector.shape_cast %11 : vector<1x128xf32> to vector<1x128xf32>
    %13 = vector.broadcast %12 : vector<1x128xf32> to vector<8x128xf32>
    %c0_12 = arith.constant 0 : index
    %c0_13 = arith.constant 0 : index
    %14 = vector.load %arg6[%c0_12, %c0_13] : memref<1x128xf32, #tpu.memory_space<vmem>>, vector<1x128xf32>
    %15 = vector.shape_cast %14 : vector<1x128xf32> to vector<1x128xf32>
    %16 = vector.broadcast %15 : vector<1x128xf32> to vector<8x128xf32>
    %cst_14 = arith.constant dense<0.000000e+00> : vector<8x128xf32>
    %17 = tpu.matmul %5, %7, %cst_14 {dimension_numbers = #tpu.dot_dimension_numbers<[1], [0], [0], [1], [0, 0, 1, 1], [], []>} : vector<8x32xf32>, vector<32x128xf32>, vector<8x128xf32> -> vector<8x128xf32>
    %18 = arith.addf %17, %10 : vector<8x128xf32>
    %19 = math.tanh %18 : vector<8x128xf32>
    %20 = arith.mulf %13, %19 : vector<8x128xf32>
    %21 = arith.addf %20, %16 : vector<8x128xf32>
    %22 = vector.extract_strided_slice %21 {offsets = [0, 0], sizes = [8, 32], strides = [1, 1]} : vector<8x128xf32> to vector<8x32xf32>
    %23 = vector.extract_strided_slice %21 {offsets = [0, 32], sizes = [8, 32], strides = [1, 1]} : vector<8x128xf32> to vector<8x32xf32>
    %24 = vector.extract_strided_slice %21 {offsets = [0, 64], sizes = [8, 32], strides = [1, 1]} : vector<8x128xf32> to vector<8x32xf32>
    %25 = vector.extract_strided_slice %21 {offsets = [0, 96], sizes = [8, 32], strides = [1, 1]} : vector<8x128xf32> to vector<8x32xf32>
    %26 = arith.mulf %23, %6 : vector<8x32xf32>
    %27 = arith.mulf %22, %24 : vector<8x32xf32>
    %28 = arith.addf %26, %27 : vector<8x32xf32>
    %29 = math.tanh %28 : vector<8x32xf32>
    %30 = arith.mulf %25, %29 : vector<8x32xf32>
    %cst_15 = arith.constant dense<0.000000e+00> : vector<8x128xf32>
    %31 = tpu.matmul %30, %7, %cst_15 {dimension_numbers = #tpu.dot_dimension_numbers<[1], [0], [0], [1], [0, 0, 1, 1], [], []>} : vector<8x32xf32>, vector<32x128xf32>, vector<8x128xf32> -> vector<8x128xf32>
    %32 = arith.addf %31, %10 : vector<8x128xf32>
    %33 = math.tanh %32 : vector<8x128xf32>
    %34 = arith.mulf %13, %33 : vector<8x128xf32>
    %35 = arith.addf %34, %16 : vector<8x128xf32>
    %36 = vector.extract_strided_slice %35 {offsets = [0, 0], sizes = [8, 32], strides = [1, 1]} : vector<8x128xf32> to vector<8x32xf32>
    %37 = vector.extract_strided_slice %35 {offsets = [0, 32], sizes = [8, 32], strides = [1, 1]} : vector<8x128xf32> to vector<8x32xf32>
    %38 = vector.extract_strided_slice %35 {offsets = [0, 64], sizes = [8, 32], strides = [1, 1]} : vector<8x128xf32> to vector<8x32xf32>
    %39 = vector.extract_strided_slice %35 {offsets = [0, 96], sizes = [8, 32], strides = [1, 1]} : vector<8x128xf32> to vector<8x32xf32>
    %40 = arith.mulf %37, %28 : vector<8x32xf32>
    %41 = arith.mulf %36, %38 : vector<8x32xf32>
    %42 = arith.addf %40, %41 : vector<8x32xf32>
    %43 = math.tanh %42 : vector<8x32xf32>
    %44 = arith.mulf %39, %43 : vector<8x32xf32>
    %cst_16 = arith.constant dense<0.000000e+00> : vector<8x128xf32>
    %45 = tpu.matmul %44, %7, %cst_16 {dimension_numbers = #tpu.dot_dimension_numbers<[1], [0], [0], [1], [0, 0, 1, 1], [], []>} : vector<8x32xf32>, vector<32x128xf32>, vector<8x128xf32> -> vector<8x128xf32>
    %46 = arith.addf %45, %10 : vector<8x128xf32>
    %47 = math.tanh %46 : vector<8x128xf32>
    %48 = arith.mulf %13, %47 : vector<8x128xf32>
    %49 = arith.addf %48, %16 : vector<8x128xf32>
    %50 = vector.extract_strided_slice %49 {offsets = [0, 0], sizes = [8, 32], strides = [1, 1]} : vector<8x128xf32> to vector<8x32xf32>
    %51 = vector.extract_strided_slice %49 {offsets = [0, 32], sizes = [8, 32], strides = [1, 1]} : vector<8x128xf32> to vector<8x32xf32>
    %52 = vector.extract_strided_slice %49 {offsets = [0, 64], sizes = [8, 32], strides = [1, 1]} : vector<8x128xf32> to vector<8x32xf32>
    %53 = vector.extract_strided_slice %49 {offsets = [0, 96], sizes = [8, 32], strides = [1, 1]} : vector<8x128xf32> to vector<8x32xf32>
    %54 = arith.mulf %51, %42 : vector<8x32xf32>
    %55 = arith.mulf %50, %52 : vector<8x32xf32>
    %56 = arith.addf %54, %55 : vector<8x32xf32>
    %57 = math.tanh %56 : vector<8x32xf32>
    %58 = arith.mulf %53, %57 : vector<8x32xf32>
    %cst_17 = arith.constant dense<0.000000e+00> : vector<8x128xf32>
    %59 = tpu.matmul %58, %7, %cst_17 {dimension_numbers = #tpu.dot_dimension_numbers<[1], [0], [0], [1], [0, 0, 1, 1], [], []>} : vector<8x32xf32>, vector<32x128xf32>, vector<8x128xf32> -> vector<8x128xf32>
    %60 = arith.addf %59, %10 : vector<8x128xf32>
    %61 = math.tanh %60 : vector<8x128xf32>
    %62 = arith.mulf %13, %61 : vector<8x128xf32>
    %63 = arith.addf %62, %16 : vector<8x128xf32>
    %64 = vector.extract_strided_slice %63 {offsets = [0, 0], sizes = [8, 32], strides = [1, 1]} : vector<8x128xf32> to vector<8x32xf32>
    %65 = vector.extract_strided_slice %63 {offsets = [0, 32], sizes = [8, 32], strides = [1, 1]} : vector<8x128xf32> to vector<8x32xf32>
    %66 = vector.extract_strided_slice %63 {offsets = [0, 64], sizes = [8, 32], strides = [1, 1]} : vector<8x128xf32> to vector<8x32xf32>
    %67 = vector.extract_strided_slice %63 {offsets = [0, 96], sizes = [8, 32], strides = [1, 1]} : vector<8x128xf32> to vector<8x32xf32>
    %68 = arith.mulf %65, %56 : vector<8x32xf32>
    %69 = arith.mulf %64, %66 : vector<8x32xf32>
    %70 = arith.addf %68, %69 : vector<8x32xf32>
    %71 = math.tanh %70 : vector<8x32xf32>
    %72 = arith.mulf %67, %71 : vector<8x32xf32>
    %cst_18 = arith.constant dense<0.000000e+00> : vector<8x128xf32>
    %73 = tpu.matmul %72, %7, %cst_18 {dimension_numbers = #tpu.dot_dimension_numbers<[1], [0], [0], [1], [0, 0, 1, 1], [], []>} : vector<8x32xf32>, vector<32x128xf32>, vector<8x128xf32> -> vector<8x128xf32>
    %74 = arith.addf %73, %10 : vector<8x128xf32>
    %75 = math.tanh %74 : vector<8x128xf32>
    %76 = arith.mulf %13, %75 : vector<8x128xf32>
    %77 = arith.addf %76, %16 : vector<8x128xf32>
    %78 = vector.extract_strided_slice %77 {offsets = [0, 0], sizes = [8, 32], strides = [1, 1]} : vector<8x128xf32> to vector<8x32xf32>
    %79 = vector.extract_strided_slice %77 {offsets = [0, 32], sizes = [8, 32], strides = [1, 1]} : vector<8x128xf32> to vector<8x32xf32>
    %80 = vector.extract_strided_slice %77 {offsets = [0, 64], sizes = [8, 32], strides = [1, 1]} : vector<8x128xf32> to vector<8x32xf32>
    %81 = vector.extract_strided_slice %77 {offsets = [0, 96], sizes = [8, 32], strides = [1, 1]} : vector<8x128xf32> to vector<8x32xf32>
    %82 = arith.mulf %79, %70 : vector<8x32xf32>
    %83 = arith.mulf %78, %80 : vector<8x32xf32>
    %84 = arith.addf %82, %83 : vector<8x32xf32>
    %85 = math.tanh %84 : vector<8x32xf32>
    %86 = arith.mulf %81, %85 : vector<8x32xf32>
    %cst_19 = arith.constant dense<0.000000e+00> : vector<8x128xf32>
    %87 = tpu.matmul %86, %7, %cst_19 {dimension_numbers = #tpu.dot_dimension_numbers<[1], [0], [0], [1], [0, 0, 1, 1], [], []>} : vector<8x32xf32>, vector<32x128xf32>, vector<8x128xf32> -> vector<8x128xf32>
    %88 = arith.addf %87, %10 : vector<8x128xf32>
    %89 = math.tanh %88 : vector<8x128xf32>
    %90 = arith.mulf %13, %89 : vector<8x128xf32>
    %91 = arith.addf %90, %16 : vector<8x128xf32>
    %92 = vector.extract_strided_slice %91 {offsets = [0, 0], sizes = [8, 32], strides = [1, 1]} : vector<8x128xf32> to vector<8x32xf32>
    %93 = vector.extract_strided_slice %91 {offsets = [0, 32], sizes = [8, 32], strides = [1, 1]} : vector<8x128xf32> to vector<8x32xf32>
    %94 = vector.extract_strided_slice %91 {offsets = [0, 64], sizes = [8, 32], strides = [1, 1]} : vector<8x128xf32> to vector<8x32xf32>
    %95 = vector.extract_strided_slice %91 {offsets = [0, 96], sizes = [8, 32], strides = [1, 1]} : vector<8x128xf32> to vector<8x32xf32>
    %96 = arith.mulf %93, %84 : vector<8x32xf32>
    %97 = arith.mulf %92, %94 : vector<8x32xf32>
    %98 = arith.addf %96, %97 : vector<8x32xf32>
    %99 = math.tanh %98 : vector<8x32xf32>
    %100 = arith.mulf %95, %99 : vector<8x32xf32>
    %cst_20 = arith.constant dense<0.000000e+00> : vector<8x128xf32>
    %101 = tpu.matmul %100, %7, %cst_20 {dimension_numbers = #tpu.dot_dimension_numbers<[1], [0], [0], [1], [0, 0, 1, 1], [], []>} : vector<8x32xf32>, vector<32x128xf32>, vector<8x128xf32> -> vector<8x128xf32>
    %102 = arith.addf %101, %10 : vector<8x128xf32>
    %103 = math.tanh %102 : vector<8x128xf32>
    %104 = arith.mulf %13, %103 : vector<8x128xf32>
    %105 = arith.addf %104, %16 : vector<8x128xf32>
    %106 = vector.extract_strided_slice %105 {offsets = [0, 0], sizes = [8, 32], strides = [1, 1]} : vector<8x128xf32> to vector<8x32xf32>
    %107 = vector.extract_strided_slice %105 {offsets = [0, 32], sizes = [8, 32], strides = [1, 1]} : vector<8x128xf32> to vector<8x32xf32>
    %108 = vector.extract_strided_slice %105 {offsets = [0, 64], sizes = [8, 32], strides = [1, 1]} : vector<8x128xf32> to vector<8x32xf32>
    %109 = vector.extract_strided_slice %105 {offsets = [0, 96], sizes = [8, 32], strides = [1, 1]} : vector<8x128xf32> to vector<8x32xf32>
    %110 = arith.mulf %107, %98 : vector<8x32xf32>
    %111 = arith.mulf %106, %108 : vector<8x32xf32>
    %112 = arith.addf %110, %111 : vector<8x32xf32>
    %113 = math.tanh %112 : vector<8x32xf32>
    %114 = arith.mulf %109, %113 : vector<8x32xf32>
    %cst_21 = arith.constant dense<0.000000e+00> : vector<8x128xf32>
    %115 = tpu.matmul %114, %7, %cst_21 {dimension_numbers = #tpu.dot_dimension_numbers<[1], [0], [0], [1], [0, 0, 1, 1], [], []>} : vector<8x32xf32>, vector<32x128xf32>, vector<8x128xf32> -> vector<8x128xf32>
    %116 = arith.addf %115, %10 : vector<8x128xf32>
    %117 = math.tanh %116 : vector<8x128xf32>
    %118 = arith.mulf %13, %117 : vector<8x128xf32>
    %119 = arith.addf %118, %16 : vector<8x128xf32>
    %120 = vector.extract_strided_slice %119 {offsets = [0, 0], sizes = [8, 32], strides = [1, 1]} : vector<8x128xf32> to vector<8x32xf32>
    %121 = vector.extract_strided_slice %119 {offsets = [0, 32], sizes = [8, 32], strides = [1, 1]} : vector<8x128xf32> to vector<8x32xf32>
    %122 = vector.extract_strided_slice %119 {offsets = [0, 64], sizes = [8, 32], strides = [1, 1]} : vector<8x128xf32> to vector<8x32xf32>
    %123 = vector.extract_strided_slice %119 {offsets = [0, 96], sizes = [8, 32], strides = [1, 1]} : vector<8x128xf32> to vector<8x32xf32>
    %124 = arith.mulf %121, %112 : vector<8x32xf32>
    %125 = arith.mulf %120, %122 : vector<8x32xf32>
    %126 = arith.addf %124, %125 : vector<8x32xf32>
    %127 = math.tanh %126 : vector<8x32xf32>
    %128 = arith.mulf %123, %127 : vector<8x32xf32>
    %cst_22 = arith.constant dense<0.000000e+00> : vector<8x128xf32>
    %129 = tpu.matmul %128, %7, %cst_22 {dimension_numbers = #tpu.dot_dimension_numbers<[1], [0], [0], [1], [0, 0, 1, 1], [], []>} : vector<8x32xf32>, vector<32x128xf32>, vector<8x128xf32> -> vector<8x128xf32>
    %130 = arith.addf %129, %10 : vector<8x128xf32>
    %131 = math.tanh %130 : vector<8x128xf32>
    %132 = arith.mulf %13, %131 : vector<8x128xf32>
    %133 = arith.addf %132, %16 : vector<8x128xf32>
    %134 = vector.extract_strided_slice %133 {offsets = [0, 0], sizes = [8, 32], strides = [1, 1]} : vector<8x128xf32> to vector<8x32xf32>
    %135 = vector.extract_strided_slice %133 {offsets = [0, 32], sizes = [8, 32], strides = [1, 1]} : vector<8x128xf32> to vector<8x32xf32>
    %136 = vector.extract_strided_slice %133 {offsets = [0, 64], sizes = [8, 32], strides = [1, 1]} : vector<8x128xf32> to vector<8x32xf32>
    %137 = vector.extract_strided_slice %133 {offsets = [0, 96], sizes = [8, 32], strides = [1, 1]} : vector<8x128xf32> to vector<8x32xf32>
    %138 = arith.mulf %135, %126 : vector<8x32xf32>
    %139 = arith.mulf %134, %136 : vector<8x32xf32>
    %140 = arith.addf %138, %139 : vector<8x32xf32>
    %141 = math.tanh %140 : vector<8x32xf32>
    %142 = arith.mulf %137, %141 : vector<8x32xf32>
    %cst_23 = arith.constant dense<0.000000e+00> : vector<8x128xf32>
    %143 = tpu.matmul %142, %7, %cst_23 {dimension_numbers = #tpu.dot_dimension_numbers<[1], [0], [0], [1], [0, 0, 1, 1], [], []>} : vector<8x32xf32>, vector<32x128xf32>, vector<8x128xf32> -> vector<8x128xf32>
    %144 = arith.addf %143, %10 : vector<8x128xf32>
    %145 = math.tanh %144 : vector<8x128xf32>
    %146 = arith.mulf %13, %145 : vector<8x128xf32>
    %147 = arith.addf %146, %16 : vector<8x128xf32>
    %148 = vector.extract_strided_slice %147 {offsets = [0, 0], sizes = [8, 32], strides = [1, 1]} : vector<8x128xf32> to vector<8x32xf32>
    %149 = vector.extract_strided_slice %147 {offsets = [0, 32], sizes = [8, 32], strides = [1, 1]} : vector<8x128xf32> to vector<8x32xf32>
    %150 = vector.extract_strided_slice %147 {offsets = [0, 64], sizes = [8, 32], strides = [1, 1]} : vector<8x128xf32> to vector<8x32xf32>
    %151 = vector.extract_strided_slice %147 {offsets = [0, 96], sizes = [8, 32], strides = [1, 1]} : vector<8x128xf32> to vector<8x32xf32>
    %152 = arith.mulf %149, %140 : vector<8x32xf32>
    %153 = arith.mulf %148, %150 : vector<8x32xf32>
    %154 = arith.addf %152, %153 : vector<8x32xf32>
    %155 = math.tanh %154 : vector<8x32xf32>
    %156 = arith.mulf %151, %155 : vector<8x32xf32>
    %cst_24 = arith.constant dense<0.000000e+00> : vector<8x128xf32>
    %157 = tpu.matmul %156, %7, %cst_24 {dimension_numbers = #tpu.dot_dimension_numbers<[1], [0], [0], [1], [0, 0, 1, 1], [], []>} : vector<8x32xf32>, vector<32x128xf32>, vector<8x128xf32> -> vector<8x128xf32>
    %158 = arith.addf %157, %10 : vector<8x128xf32>
    %159 = math.tanh %158 : vector<8x128xf32>
    %160 = arith.mulf %13, %159 : vector<8x128xf32>
    %161 = arith.addf %160, %16 : vector<8x128xf32>
    %162 = vector.extract_strided_slice %161 {offsets = [0, 0], sizes = [8, 32], strides = [1, 1]} : vector<8x128xf32> to vector<8x32xf32>
    %163 = vector.extract_strided_slice %161 {offsets = [0, 32], sizes = [8, 32], strides = [1, 1]} : vector<8x128xf32> to vector<8x32xf32>
    %164 = vector.extract_strided_slice %161 {offsets = [0, 64], sizes = [8, 32], strides = [1, 1]} : vector<8x128xf32> to vector<8x32xf32>
    %165 = vector.extract_strided_slice %161 {offsets = [0, 96], sizes = [8, 32], strides = [1, 1]} : vector<8x128xf32> to vector<8x32xf32>
    %166 = arith.mulf %163, %154 : vector<8x32xf32>
    %167 = arith.mulf %162, %164 : vector<8x32xf32>
    %168 = arith.addf %166, %167 : vector<8x32xf32>
    %169 = math.tanh %168 : vector<8x32xf32>
    %170 = arith.mulf %165, %169 : vector<8x32xf32>
    %cst_25 = arith.constant dense<0.000000e+00> : vector<8x128xf32>
    %171 = tpu.matmul %170, %7, %cst_25 {dimension_numbers = #tpu.dot_dimension_numbers<[1], [0], [0], [1], [0, 0, 1, 1], [], []>} : vector<8x32xf32>, vector<32x128xf32>, vector<8x128xf32> -> vector<8x128xf32>
    %172 = arith.addf %171, %10 : vector<8x128xf32>
    %173 = math.tanh %172 : vector<8x128xf32>
    %174 = arith.mulf %13, %173 : vector<8x128xf32>
    %175 = arith.addf %174, %16 : vector<8x128xf32>
    %176 = vector.extract_strided_slice %175 {offsets = [0, 0], sizes = [8, 32], strides = [1, 1]} : vector<8x128xf32> to vector<8x32xf32>
    %177 = vector.extract_strided_slice %175 {offsets = [0, 32], sizes = [8, 32], strides = [1, 1]} : vector<8x128xf32> to vector<8x32xf32>
    %178 = vector.extract_strided_slice %175 {offsets = [0, 64], sizes = [8, 32], strides = [1, 1]} : vector<8x128xf32> to vector<8x32xf32>
    %179 = vector.extract_strided_slice %175 {offsets = [0, 96], sizes = [8, 32], strides = [1, 1]} : vector<8x128xf32> to vector<8x32xf32>
    %180 = arith.mulf %177, %168 : vector<8x32xf32>
    %181 = arith.mulf %176, %178 : vector<8x32xf32>
    %182 = arith.addf %180, %181 : vector<8x32xf32>
    %183 = math.tanh %182 : vector<8x32xf32>
    %184 = arith.mulf %179, %183 : vector<8x32xf32>
    %cst_26 = arith.constant dense<0.000000e+00> : vector<8x128xf32>
    %185 = tpu.matmul %184, %7, %cst_26 {dimension_numbers = #tpu.dot_dimension_numbers<[1], [0], [0], [1], [0, 0, 1, 1], [], []>} : vector<8x32xf32>, vector<32x128xf32>, vector<8x128xf32> -> vector<8x128xf32>
    %186 = arith.addf %185, %10 : vector<8x128xf32>
    %187 = math.tanh %186 : vector<8x128xf32>
    %188 = arith.mulf %13, %187 : vector<8x128xf32>
    %189 = arith.addf %188, %16 : vector<8x128xf32>
    %190 = vector.extract_strided_slice %189 {offsets = [0, 0], sizes = [8, 32], strides = [1, 1]} : vector<8x128xf32> to vector<8x32xf32>
    %191 = vector.extract_strided_slice %189 {offsets = [0, 32], sizes = [8, 32], strides = [1, 1]} : vector<8x128xf32> to vector<8x32xf32>
    %192 = vector.extract_strided_slice %189 {offsets = [0, 64], sizes = [8, 32], strides = [1, 1]} : vector<8x128xf32> to vector<8x32xf32>
    %193 = vector.extract_strided_slice %189 {offsets = [0, 96], sizes = [8, 32], strides = [1, 1]} : vector<8x128xf32> to vector<8x32xf32>
    %194 = arith.mulf %191, %182 : vector<8x32xf32>
    %195 = arith.mulf %190, %192 : vector<8x32xf32>
    %196 = arith.addf %194, %195 : vector<8x32xf32>
    %197 = math.tanh %196 : vector<8x32xf32>
    %198 = arith.mulf %193, %197 : vector<8x32xf32>
    %cst_27 = arith.constant dense<0.000000e+00> : vector<8x128xf32>
    %199 = tpu.matmul %198, %7, %cst_27 {dimension_numbers = #tpu.dot_dimension_numbers<[1], [0], [0], [1], [0, 0, 1, 1], [], []>} : vector<8x32xf32>, vector<32x128xf32>, vector<8x128xf32> -> vector<8x128xf32>
    %200 = arith.addf %199, %10 : vector<8x128xf32>
    %201 = math.tanh %200 : vector<8x128xf32>
    %202 = arith.mulf %13, %201 : vector<8x128xf32>
    %203 = arith.addf %202, %16 : vector<8x128xf32>
    %204 = vector.extract_strided_slice %203 {offsets = [0, 0], sizes = [8, 32], strides = [1, 1]} : vector<8x128xf32> to vector<8x32xf32>
    %205 = vector.extract_strided_slice %203 {offsets = [0, 32], sizes = [8, 32], strides = [1, 1]} : vector<8x128xf32> to vector<8x32xf32>
    %206 = vector.extract_strided_slice %203 {offsets = [0, 64], sizes = [8, 32], strides = [1, 1]} : vector<8x128xf32> to vector<8x32xf32>
    %207 = vector.extract_strided_slice %203 {offsets = [0, 96], sizes = [8, 32], strides = [1, 1]} : vector<8x128xf32> to vector<8x32xf32>
    %208 = arith.mulf %205, %196 : vector<8x32xf32>
    %209 = arith.mulf %204, %206 : vector<8x32xf32>
    %210 = arith.addf %208, %209 : vector<8x32xf32>
    %211 = math.tanh %210 : vector<8x32xf32>
    %212 = arith.mulf %207, %211 : vector<8x32xf32>
    %cst_28 = arith.constant dense<0.000000e+00> : vector<8x128xf32>
    %213 = tpu.matmul %212, %7, %cst_28 {dimension_numbers = #tpu.dot_dimension_numbers<[1], [0], [0], [1], [0, 0, 1, 1], [], []>} : vector<8x32xf32>, vector<32x128xf32>, vector<8x128xf32> -> vector<8x128xf32>
    %214 = arith.addf %213, %10 : vector<8x128xf32>
    %215 = math.tanh %214 : vector<8x128xf32>
    %216 = arith.mulf %13, %215 : vector<8x128xf32>
    %217 = arith.addf %216, %16 : vector<8x128xf32>
    %218 = vector.extract_strided_slice %217 {offsets = [0, 0], sizes = [8, 32], strides = [1, 1]} : vector<8x128xf32> to vector<8x32xf32>
    %219 = vector.extract_strided_slice %217 {offsets = [0, 32], sizes = [8, 32], strides = [1, 1]} : vector<8x128xf32> to vector<8x32xf32>
    %220 = vector.extract_strided_slice %217 {offsets = [0, 64], sizes = [8, 32], strides = [1, 1]} : vector<8x128xf32> to vector<8x32xf32>
    %221 = vector.extract_strided_slice %217 {offsets = [0, 96], sizes = [8, 32], strides = [1, 1]} : vector<8x128xf32> to vector<8x32xf32>
    %222 = arith.mulf %219, %210 : vector<8x32xf32>
    %223 = arith.mulf %218, %220 : vector<8x32xf32>
    %224 = arith.addf %222, %223 : vector<8x32xf32>
    %225 = math.tanh %224 : vector<8x32xf32>
    %226 = arith.mulf %221, %225 : vector<8x32xf32>
    %227 = tpu.concatenate %30, %44, %58, %72, %86, %100, %114, %128, %142, %156, %170, %184, %198, %212, %226 in 0 : vector<8x32xf32>, vector<8x32xf32>, vector<8x32xf32>, vector<8x32xf32>, vector<8x32xf32>, vector<8x32xf32>, vector<8x32xf32>, vector<8x32xf32>, vector<8x32xf32>, vector<8x32xf32>, vector<8x32xf32>, vector<8x32xf32>, vector<8x32xf32>, vector<8x32xf32>, vector<8x32xf32> -> vector<120x32xf32>
    %c0_29 = arith.constant 0 : index
    %c0_30 = arith.constant 0 : index
    %228 = vector.load %arg7[%c0_29, %c0_30] : memref<32x128xf32, #tpu.memory_space<vmem>>, vector<32x128xf32>
    %cst_31 = arith.constant dense<0.000000e+00> : vector<120x128xf32>
    %229 = tpu.matmul %227, %228, %cst_31 {dimension_numbers = #tpu.dot_dimension_numbers<[1], [0], [0], [1], [0, 0, 1, 1], [], []>} : vector<120x32xf32>, vector<32x128xf32>, vector<120x128xf32> -> vector<120x128xf32>
    %c0_32 = arith.constant 0 : index
    %c0_33 = arith.constant 0 : index
    %230 = vector.load %arg8[%c0_32, %c0_33] : memref<1x128xf32, #tpu.memory_space<vmem>>, vector<1x128xf32>
    %231 = vector.broadcast %230 : vector<1x128xf32> to vector<120x128xf32>
    %232 = arith.addf %229, %231 : vector<120x128xf32>
    %c0_34 = arith.constant 0 : index
    %c0_35 = arith.constant 0 : index
    %233 = vector.load %arg9[%c0_34, %c0_35] : memref<120x128xf32, #tpu.memory_space<vmem>>, vector<120x128xf32>
    tpu.vector_store %arg9[%c0_34, %c0_35], %232 {strides = array<i32>} : memref<120x128xf32, #tpu.memory_space<vmem>>, vector<120x128xf32>,
    return
  }
}

</mosaic_0001>

<bundles_post_ra>
// kernel: decoder_forward.1
= control target key start
LH: loop header
LB: loop body
LE: loop exit
PB: predicated region body
PF: predicated region fallthrough
CT: control target
= control target key end

     0   :  { %v2266_v0 = vmov 0.0|0.0   ;;  %vm2267_vm0 = vmmov 0   ;;  %v2268_v3 = vmov 0.0   ;;  %vm42_vm1 = vcmask 130048   ;;  %s2270_s27 = smov 32   ;;  %s2767_s1 = inlined_call_operand.vmem [shape: f32[16,32], index: 1, kind: input, shape index: {}]   ;;  %s2768_s3 = inlined_call_operand.vmem [shape: f32[32,128], index: 3, kind: input, shape index: {}]   ;;  %s2769_s0 = inlined_call_operand.vmem [shape: f32[8,16], index: 0, kind: input, shape index: {}]   ;;  %s2770_s2 = inlined_call_operand.vmem [shape: f32[1,32], index: 2, kind: input, shape index: {}]   ;;  %s2771_s4 = inlined_call_operand.vmem [shape: f32[1,128], index: 4, kind: input, shape index: {}]   ;;  %s2772_s5 = inlined_call_operand.vmem [shape: f32[1,128], index: 5, kind: input, shape index: {}]   ;;  %s2773_s6 = inlined_call_operand.vmem [shape: f32[1,128], index: 6, kind: input, shape index: {}]   ;;  %s2774_s7 = inlined_call_operand.vmem [shape: f32[32,128], index: 7, kind: input, shape index: {}]   ;;  %s2775_s8 = inlined_call_operand.vmem [shape: f32[1,128], index: 8, kind: input, shape index: {}]   ;;  %s2776_s9 = inlined_call_operand.vmem [shape: f32[120,128], index: 9, kind: output, shape index: {}]  }
   0x1   :  { %2098 = vmatprep.subr.bf16.mxu0 %v2266_v0  ;;  %v33_v1 = vld [vmem:[%s2767_s1] sm:$0xff]  ;;  %v34_v2 = vld [vmem:[%s2767_s1 + $0x8] sm:$0xff]  ;;  %1877 = vmatprep.mubr.msk.f32.mxu0 %vm2267_vm0, %v2268_v3  ;;  %v118_v9 = vld [vmem:[%s2768_s3 + $0x10] sm:$0xff]  ;;  %vm141_vm2 = vcmask 261120  }
   0x2   :  { %v2099_v4 = vpack.c.bf16 %v34_v2, %v33_v1  ;;  %2101 = vmatprep.subr.bf16.mxu1 %v2266_v0  ;;  %v116_v5 = vld [vmem:[%s2768_s3] sm:$0xff]  ;;  %v117_v6 = vld [vmem:[%s2768_s3 + $0x8] sm:$0xff]  ;;  %1888 = vmatprep.mubr.msk.f32.mxu1 %vm2267_vm0, %v2268_v3  ;;  %v119_v10 = vld [vmem:[%s2768_s3 + $0x18] sm:$0xff] }
   0x3   :  { %v2339_v7 = vpack.c.bf16 %v117_v6, %v116_v5  ;;  %v32_v8 = vld [vmem:[%s2769_s0] sm:$0xff]  ;;  %v2357_v11 = vpack.c.bf16 %v119_v10, %v118_v9 }
   0x4   :  { %2100 = vmatpush3.bf16.msra.mxu0 %v2099_v4  ;;  %v1740_v12 = vld [vmem:[%s2770_s2] ss:$0 sm:$0xff] }
   0x5   :  { %2103 = vmatpush3.bf16.msra.mxu1 %v2339_v7  ;;  %2107 = vmatprep.subr.bf16.mxu0 %v2266_v0  ;;  %v2376_v16 = vld [vmem:[%s2771_s4] ss:$0 sm:$0xff]  ;;  %s2269_s4 = smov 64  }
   0x6   :  { %2104 = vmatprep.subr.bf16.mxu1 %v2266_v0  ;;  %v2382_v20 = vld [vmem:[%s2772_s5] ss:$0 sm:$0xff] }
   0x7   :  { %1878 = vmatmul.mubr.msk.f32.vlgmr.msra.gmra.mrb[0].mxu0 %vm42_vm1, %v32_v8  ;;  %v2387_v22 = vld [vmem:[%s2773_s6] ss:$0 sm:$0xff] }
   0x8   :  { %2109 = vmatpush3.bf16.msra.mxu0 %v2339_v7  ;;  %1899 = vmatprep.mubr.msk.f32.mxu0 %vm2267_vm0, %v2268_v3 }
   0x9   :  { %2110 = vmatprep.subr.bf16.mxu0 %v2266_v0  ;;  %2106 = vmatpush3.bf16.msra.mxu1 %v2357_v11 }
   0xa   :  { %2113 = vmatprep.subr.bf16.mxu1 %v2266_v0 }
   0xc   :  { %2112 = vmatpush3.bf16.msra.mxu0 %v2357_v11 }
   0xd   :  { %2119 = vmatprep.subr.bf16.mxu0 %v2266_v0 }
  0xda   :  { %v112_v13 = vpop.f32.mrb[0].mxu0 }
  0xdb   :  { %v113_v14 = vadd.f32 %v1740_v12, %v112_v13  ;;  %v1879_v15 = vpop.f32.mrb[1].mxu0 }
  0xdd   :  { %1889 = vmatmul.mubr.msk.f32.vlgmr.msra.gmra.mrb[0].mxu1 %vm141_vm2, %v113_v14 }
  0xde   :  { %2115 = vmatpush3.bf16.msra.mxu1 %v2339_v7  ;;  %1910 = vmatprep.mubr.msk.f32.mxu1 %vm2267_vm0, %v2268_v3 }
  0xdf   :  { %2116 = vmatprep.subr.bf16.mxu1 %v2266_v0 }
  0xe2   :  { %2118 = vmatpush3.bf16.msra.mxu1 %v2357_v11 }
  0xe3   :  { %2125 = vmatprep.subr.bf16.mxu1 %v2266_v0 }
 0x1b0   :  { %v211_v17 = vpop.f32.mrb[0].mxu1 }
 0x1b1   :  { %v212_v18 = vadd.f32 %v2376_v16, %v211_v17  ;;  %v1890_v19 = vpop.f32.mrb[1].mxu1 }
 0x1b3   :  { %2206 = vtanh.f32 %v212_v18 }
 0x1bd   :  { %v2207_v21 = vpop.eup %2206 }
 0x1be   :  { %v216_v23 = vmul.f32 %v2207_v21, %v2382_v20 }
 0x1c0   :  { %v217_v24 = vadd.f32 %v2387_v22, %v216_v23 }
 0x1c2   :  { %220 = vrot.lane.b32.xlu0 %v217_v24, %s2269_s4  ;;  %v218_v27 = vmul.f32 0.0, %v217_v24 }
 0x234   :  { %v221_v25 = vpop.permute.xlu0 %220 }
 0x235   :  { %v223_v26 = vmul.f32 %v221_v25, %v217_v24 }
 0x237   :  { %225 = vrot.lane.b32.xlu0 %v223_v26, %s2270_s27 }
 0x2a9   :  { %v226_v28 = vpop.permute.xlu0 %225 }
 0x2aa   :  { %v228_v29 = vadd.f32 %v226_v28, %v218_v27 }
 0x2ac   :  { %2208 = vtanh.f32 %v228_v29 }
 0x2b6   :  { %v2209_v30 = vpop.eup %2208 }
 0x2b7   :  { %231 = vrot.lane.b32.xlu1 %v2209_v30, %s2269_s4 }
 0x329   :  { %v232_v31 = vpop.permute.xlu1 %231 }
 0x32a   :  { %v234_v32 = vmul.f32 %v232_v31, %v217_v24 }
 0x32c   :  { %236 = vrot.lane.b32.xlu1 %v234_v32, %s2270_s27 }
 0x39e   :  { %v2395_v33 = vpop.permute.xlu1 %236 }
 0x39f   :  { %1900 = vmatmul.mubr.msk.f32.vlgmr.msra.gmra.mrb[2].mxu0 %vm141_vm2, %v2395_v33 }
 0x3a0   :  { %2121 = vmatpush3.bf16.msra.mxu0 %v2339_v7  ;;  %1921 = vmatprep.mubr.msk.f32.mxu0 %vm2267_vm0, %v2268_v3 }
 0x3a1   :  { %2122 = vmatprep.subr.bf16.mxu0 %v2266_v0 }
 0x3a4   :  { %2124 = vmatpush3.bf16.msra.mxu0 %v2357_v11 }
 0x3a5   :  { %2131 = vmatprep.subr.bf16.mxu0 %v2266_v0 }
 0x472   :  { %v306_v34 = vpop.f32.mrb[2].mxu0 }
 0x473   :  { %v307_v35 = vadd.f32 %v2376_v16, %v306_v34  ;;  %v1901_v36 = vpop.f32.mrb[3].mxu0 }
 0x475   :  { %2210 = vtanh.f32 %v307_v35 }
 0x47f   :  { %v2211_v37 = vpop.eup %2210 }
 0x480   :  { %v311_v38 = vmul.f32 %v2211_v37, %v2382_v20 }
 0x482   :  { %v312_v39 = vadd.f32 %v2387_v22, %v311_v38 }
 0x484   :  { %315 = vrot.lane.b32.xlu0 %v312_v39, %s2269_s4  ;;  %v313_v42 = vmul.f32 %v312_v39, %v228_v29 }
 0x4f6   :  { %v316_v40 = vpop.permute.xlu0 %315 }
 0x4f7   :  { %v318_v41 = vmul.f32 %v316_v40, %v312_v39 }
 0x4f9   :  { %320 = vrot.lane.b32.xlu1 %v318_v41, %s2270_s27 }
 0x56b   :  { %v321_v43 = vpop.permute.xlu1 %320 }
 0x56c   :  { %v323_v44 = vadd.f32 %v321_v43, %v313_v42 }
 0x56e   :  { %2212 = vtanh.f32 %v323_v44 }
 0x578   :  { %v2213_v45 = vpop.eup %2212 }
 0x579   :  { %326 = vrot.lane.b32.xlu0 %v2213_v45, %s2269_s4 }
 0x5eb   :  { %v327_v46 = vpop.permute.xlu0 %326 }
 0x5ec   :  { %v329_v47 = vmul.f32 %v327_v46, %v312_v39 }
 0x5ee   :  { %331 = vrot.lane.b32.xlu1 %v329_v47, %s2270_s27 }
 0x660   :  { %v2412_v48 = vpop.permute.xlu1 %331 }
 0x661   :  { %1911 = vmatmul.mubr.msk.f32.vlgmr.msra.gmra.mrb[2].mxu1 %vm141_vm2, %v2412_v48 }
 0x662   :  { %2127 = vmatpush3.bf16.msra.mxu1 %v2339_v7  ;;  %1932 = vmatprep.mubr.msk.f32.mxu1 %vm2267_vm0, %v2268_v3 }
 0x663   :  { %2128 = vmatprep.subr.bf16.mxu1 %v2266_v0 }
 0x666   :  { %2130 = vmatpush3.bf16.msra.mxu1 %v2357_v11 }
 0x667   :  { %2137 = vmatprep.subr.bf16.mxu1 %v2266_v0 }
 0x734   :  { %v401_v49 = vpop.f32.mrb[2].mxu1 }
 0x735   :  { %v402_v50 = vadd.f32 %v2376_v16, %v401_v49  ;;  %v1912_v51 = vpop.f32.mrb[3].mxu1 }
 0x737   :  { %2214 = vtanh.f32 %v402_v50 }
 0x741   :  { %v2215_v52 = vpop.eup %2214 }
 0x742   :  { %v406_v53 = vmul.f32 %v2215_v52, %v2382_v20 }
 0x744   :  { %v407_v54 = vadd.f32 %v2387_v22, %v406_v53 }
 0x746   :  { %410 = vrot.lane.b32.xlu0 %v407_v54, %s2269_s4  ;;  %v408_v57 = vmul.f32 %v407_v54, %v323_v44 }
 0x7b8   :  { %v411_v55 = vpop.permute.xlu0 %410 }
 0x7b9   :  { %v413_v56 = vmul.f32 %v411_v55, %v407_v54 }
 0x7bb   :  { %415 = vrot.lane.b32.xlu1 %v413_v56, %s2270_s27 }
 0x82d   :  { %v416_v58 = vpop.permute.xlu1 %415 }
 0x82e   :  { %v418_v59 = vadd.f32 %v416_v58, %v408_v57 }
 0x830   :  { %2216 = vtanh.f32 %v418_v59 }
 0x83a   :  { %v2217_v60 = vpop.eup %2216 }
 0x83b   :  { %421 = vrot.lane.b32.xlu0 %v2217_v60, %s2269_s4 }
 0x8ad   :  { %v422_v61 = vpop.permute.xlu0 %421 }
 0x8ae   :  { %v424_v62 = vmul.f32 %v422_v61, %v407_v54 }
 0x8b0   :  { %426 = vrot.lane.b32.xlu1 %v424_v62, %s2270_s27 }
 0x922   :  { %v2429_v63 = vpop.permute.xlu1 %426 }
 0x923   :  { %1922 = vmatmul.mubr.msk.f32.vlgmr.msra.gmra.mrb[4].mxu0 %vm141_vm2, %v2429_v63 }
 0x924   :  { %2133 = vmatpush3.bf16.msra.mxu0 %v2339_v7  ;;  %1943 = vmatprep.mubr.msk.f32.mxu0 %vm2267_vm0, %v2268_v3 }
 0x925   :  { %2134 = vmatprep.subr.bf16.mxu0 %v2266_v0 }
 0x928   :  { %2136 = vmatpush3.bf16.msra.mxu0 %v2357_v11 }
 0x929   :  { %2143 = vmatprep.subr.bf16.mxu0 %v2266_v0 }
 0x9f6   :  { %v496_v1 = vpop.f32.mrb[4].mxu0 }
 0x9f7   :  { %v497_v2 = vadd.f32 %v2376_v16, %v496_v1  ;;  %v1923_v4 = vpop.f32.mrb[5].mxu0 }
 0x9f9   :  { %2218 = vtanh.f32 %v497_v2 }
 0xa03   :  { %v2219_v5 = vpop.eup %2218 }
 0xa04   :  { %v501_v6 = vmul.f32 %v2219_v5, %v2382_v20 }
 0xa06   :  { %v502_v8 = vadd.f32 %v2387_v22, %v501_v6 }
 0xa08   :  { %505 = vrot.lane.b32.xlu0 %v502_v8, %s2269_s4  ;;  %v503_v12 = vmul.f32 %v502_v8, %v418_v59 }
 0xa7a   :  { %v506_v9 = vpop.permute.xlu0 %505 }
 0xa7b   :  { %v508_v10 = vmul.f32 %v506_v9, %v502_v8 }
 0xa7d   :  { %510 = vrot.lane.b32.xlu1 %v508_v10, %s2270_s27 }
 0xaef   :  { %v511_v13 = vpop.permute.xlu1 %510 }
 0xaf0   :  { %v513_v14 = vadd.f32 %v511_v13, %v503_v12 }
 0xaf2   :  { %2220 = vtanh.f32 %v513_v14 }
 0xafc   :  { %v2221_v15 = vpop.eup %2220 }
 0xafd   :  { %516 = vrot.lane.b32.xlu0 %v2221_v15, %s2269_s4 }
 0xb6f   :  { %v517_v17 = vpop.permute.xlu0 %516 }
 0xb70   :  { %v519_v18 = vmul.f32 %v517_v17, %v502_v8 }
 0xb72   :  { %521 = vrot.lane.b32.xlu1 %v519_v18, %s2270_s27 }
 0xbe4   :  { %v2446_v19 = vpop.permute.xlu1 %521 }
 0xbe5   :  { %1933 = vmatmul.mubr.msk.f32.vlgmr.msra.gmra.mrb[4].mxu1 %vm141_vm2, %v2446_v19 }
 0xbe6   :  { %2139 = vmatpush3.bf16.msra.mxu1 %v2339_v7  ;;  %1954 = vmatprep.mubr.msk.f32.mxu1 %vm2267_vm0, %v2268_v3 }
 0xbe7   :  { %2140 = vmatprep.subr.bf16.mxu1 %v2266_v0 }
 0xbea   :  { %2142 = vmatpush3.bf16.msra.mxu1 %v2357_v11 }
 0xbeb   :  { %2149 = vmatprep.subr.bf16.mxu1 %v2266_v0 }
 0xcb8   :  { %v591_v21 = vpop.f32.mrb[4].mxu1 }
 0xcb9   :  { %v592_v23 = vadd.f32 %v2376_v16, %v591_v21  ;;  %v1934_v24 = vpop.f32.mrb[5].mxu1 }
 0xcbb   :  { %2222 = vtanh.f32 %v592_v23 }
 0xcc5   :  { %v2223_v25 = vpop.eup %2222 }
 0xcc6   :  { %v596_v26 = vmul.f32 %v2223_v25, %v2382_v20 }
 0xcc8   :  { %v597_v27 = vadd.f32 %v2387_v22, %v596_v26 }
 0xcca   :  { %600 = vrot.lane.b32.xlu0 %v597_v27, %s2269_s4  ;;  %v598_v30 = vmul.f32 %v597_v27, %v513_v14 }
 0xd3c   :  { %v601_v28 = vpop.permute.xlu0 %600 }
 0xd3d   :  { %v603_v29 = vmul.f32 %v601_v28, %v597_v27 }
 0xd3f   :  { %605 = vrot.lane.b32.xlu1 %v603_v29, %s2270_s27 }
 0xdb1   :  { %v606_v31 = vpop.permute.xlu1 %605 }
 0xdb2   :  { %v608_v32 = vadd.f32 %v606_v31, %v598_v30 }
 0xdb4   :  { %2224 = vtanh.f32 %v608_v32 }
 0xdbe   :  { %v2225_v34 = vpop.eup %2224 }
 0xdbf   :  { %611 = vrot.lane.b32.xlu0 %v2225_v34, %s2269_s4 }
 0xe31   :  { %v612_v35 = vpop.permute.xlu0 %611 }
 0xe32   :  { %v614_v36 = vmul.f32 %v612_v35, %v597_v27 }
 0xe34   :  { %616 = vrot.lane.b32.xlu1 %v614_v36, %s2270_s27 }
 0xea6   :  { %v2463_v37 = vpop.permute.xlu1 %616 }
 0xea7   :  { %1944 = vmatmul.mubr.msk.f32.vlgmr.msra.gmra.mrb[6].mxu0 %vm141_vm2, %v2463_v37 }
 0xea8   :  { %2145 = vmatpush3.bf16.msra.mxu0 %v2339_v7  ;;  %1965 = vmatprep.mubr.msk.f32.mxu0 %vm2267_vm0, %v2268_v3 }
 0xea9   :  { %2146 = vmatprep.subr.bf16.mxu0 %v2266_v0 }
 0xeac   :  { %2148 = vmatpush3.bf16.msra.mxu0 %v2357_v11 }
 0xead   :  { %2155 = vmatprep.subr.bf16.mxu0 %v2266_v0 }
 0xf7a   :  { %v686_v38 = vpop.f32.mrb[6].mxu0 }
 0xf7b   :  { %v687_v39 = vadd.f32 %v2376_v16, %v686_v38  ;;  %v1945_v40 = vpop.f32.mrb[7].mxu0 }
 0xf7d   :  { %2226 = vtanh.f32 %v687_v39 }
 0xf87   :  { %v2227_v41 = vpop.eup %2226 }
 0xf88   :  { %v691_v42 = vmul.f32 %v2227_v41, %v2382_v20 }
 0xf8a   :  { %v692_v43 = vadd.f32 %v2387_v22, %v691_v42 }
 0xf8c   :  { %695 = vrot.lane.b32.xlu0 %v692_v43, %s2269_s4  ;;  %v693_v46 = vmul.f32 %v692_v43, %v608_v32 }
 0xffe   :  { %v696_v44 = vpop.permute.xlu0 %695 }
 0xfff   :  { %v698_v45 = vmul.f32 %v696_v44, %v692_v43 }
0x1001   :  { %700 = vrot.lane.b32.xlu1 %v698_v45, %s2270_s27 }
0x1073   :  { %v701_v47 = vpop.permute.xlu1 %700 }
0x1074   :  { %v703_v49 = vadd.f32 %v701_v47, %v693_v46 }
0x1076   :  { %2228 = vtanh.f32 %v703_v49 }
0x1080   :  { %v2229_v50 = vpop.eup %2228 }
0x1081   :  { %706 = vrot.lane.b32.xlu0 %v2229_v50, %s2269_s4 }
0x10f3   :  { %v707_v51 = vpop.permute.xlu0 %706 }
0x10f4   :  { %v709_v52 = vmul.f32 %v707_v51, %v692_v43 }
0x10f6   :  { %711 = vrot.lane.b32.xlu1 %v709_v52, %s2270_s27 }
0x1168   :  { %v2480_v53 = vpop.permute.xlu1 %711 }
0x1169   :  { %1955 = vmatmul.mubr.msk.f32.vlgmr.msra.gmra.mrb[6].mxu1 %vm141_vm2, %v2480_v53 }
0x116a   :  { %2151 = vmatpush3.bf16.msra.mxu1 %v2339_v7  ;;  %1976 = vmatprep.mubr.msk.f32.mxu1 %vm2267_vm0, %v2268_v3 }
0x116b   :  { %2152 = vmatprep.subr.bf16.mxu1 %v2266_v0 }
0x116e   :  { %2154 = vmatpush3.bf16.msra.mxu1 %v2357_v11 }
0x116f   :  { %2161 = vmatprep.subr.bf16.mxu1 %v2266_v0 }
0x123c   :  { %v781_v54 = vpop.f32.mrb[6].mxu1 }
0x123d   :  { %v782_v55 = vadd.f32 %v2376_v16, %v781_v54  ;;  %v1956_v56 = vpop.f32.mrb[7].mxu1 }
0x123f   :  { %2230 = vtanh.f32 %v782_v55 }
0x1249   :  { %v2231_v57 = vpop.eup %2230 }
0x124a   :  { %v786_v58 = vmul.f32 %v2231_v57, %v2382_v20 }
0x124c   :  { %v787_v59 = vadd.f32 %v2387_v22, %v786_v58 }
0x124e   :  { %790 = vrot.lane.b32.xlu0 %v787_v59, %s2269_s4  ;;  %v788_v62 = vmul.f32 %v787_v59, %v703_v49 }
0x12c0   :  { %v791_v60 = vpop.permute.xlu0 %790 }
0x12c1   :  { %v793_v61 = vmul.f32 %v791_v60, %v787_v59 }
0x12c3   :  { %795 = vrot.lane.b32.xlu1 %v793_v61, %s2270_s27 }
0x1335   :  { %v796_v1 = vpop.permute.xlu1 %795 }
0x1336   :  { %v798_v2 = vadd.f32 %v796_v1, %v788_v62 }
0x1338   :  { %2232 = vtanh.f32 %v798_v2 }
0x1342   :  { %v2233_v4 = vpop.eup %2232 }
0x1343   :  { %801 = vrot.lane.b32.xlu0 %v2233_v4, %s2269_s4 }
0x13b5   :  { %v802_v5 = vpop.permute.xlu0 %801 }
0x13b6   :  { %v804_v6 = vmul.f32 %v802_v5, %v787_v59 }
0x13b8   :  { %806 = vrot.lane.b32.xlu1 %v804_v6, %s2270_s27 }
0x142a   :  { %v2497_v8 = vpop.permute.xlu1 %806 }
0x142b   :  { %1966 = vmatmul.mubr.msk.f32.vlgmr.msra.gmra.mrb[8].mxu0 %vm141_vm2, %v2497_v8 }
0x142c   :  { %2157 = vmatpush3.bf16.msra.mxu0 %v2339_v7  ;;  %1987 = vmatprep.mubr.msk.f32.mxu0 %vm2267_vm0, %v2268_v3 }
0x142d   :  { %2158 = vmatprep.subr.bf16.mxu0 %v2266_v0 }
0x1430   :  { %2160 = vmatpush3.bf16.msra.mxu0 %v2357_v11 }
0x1431   :  { %2167 = vmatprep.subr.bf16.mxu0 %v2266_v0 }
0x14fe   :  { %v876_v9 = vpop.f32.mrb[8].mxu0 }
0x14ff   :  { %v877_v10 = vadd.f32 %v2376_v16, %v876_v9  ;;  %v1967_v12 = vpop.f32.mrb[9].mxu0 }
0x1501   :  { %2234 = vtanh.f32 %v877_v10 }
0x150b   :  { %v2235_v13 = vpop.eup %2234 }
0x150c   :  { %v881_v14 = vmul.f32 %v2235_v13, %v2382_v20 }
0x150e   :  { %v882_v15 = vadd.f32 %v2387_v22, %v881_v14 }
0x1510   :  { %885 = vrot.lane.b32.xlu0 %v882_v15, %s2269_s4  ;;  %v883_v21 = vmul.f32 %v882_v15, %v798_v2 }
0x1582   :  { %v886_v17 = vpop.permute.xlu0 %885 }
0x1583   :  { %v888_v18 = vmul.f32 %v886_v17, %v882_v15 }
0x1585   :  { %890 = vrot.lane.b32.xlu1 %v888_v18, %s2270_s27 }
0x15f7   :  { %v891_v23 = vpop.permute.xlu1 %890 }
0x15f8   :  { %v893_v24 = vadd.f32 %v891_v23, %v883_v21 }
0x15fa   :  { %2236 = vtanh.f32 %v893_v24 }
0x1604   :  { %v2237_v25 = vpop.eup %2236 }
0x1605   :  { %896 = vrot.lane.b32.xlu0 %v2237_v25, %s2269_s4 }
0x1677   :  { %v897_v26 = vpop.permute.xlu0 %896 }
0x1678   :  { %v899_v27 = vmul.f32 %v897_v26, %v882_v15 }
0x167a   :  { %901 = vrot.lane.b32.xlu1 %v899_v27, %s2270_s27 }
0x16ec   :  { %v2514_v28 = vpop.permute.xlu1 %901 }
0x16ed   :  { %1977 = vmatmul.mubr.msk.f32.vlgmr.msra.gmra.mrb[8].mxu1 %vm141_vm2, %v2514_v28 }
0x16ee   :  { %2163 = vmatpush3.bf16.msra.mxu1 %v2339_v7  ;;  %1998 = vmatprep.mubr.msk.f32.mxu1 %vm2267_vm0, %v2268_v3 }
0x16ef   :  { %2164 = vmatprep.subr.bf16.mxu1 %v2266_v0 }
0x16f2   :  { %2166 = vmatpush3.bf16.msra.mxu1 %v2357_v11 }
0x16f3   :  { %2173 = vmatprep.subr.bf16.mxu1 %v2266_v0 }
0x17c0   :  { %v971_v29 = vpop.f32.mrb[8].mxu1 }
0x17c1   :  { %v972_v30 = vadd.f32 %v2376_v16, %v971_v29  ;;  %v1978_v31 = vpop.f32.mrb[9].mxu1 }
0x17c3   :  { %2238 = vtanh.f32 %v972_v30 }
0x17cd   :  { %v2239_v32 = vpop.eup %2238 }
0x17ce   :  { %v976_v34 = vmul.f32 %v2239_v32, %v2382_v20 }
0x17d0   :  { %v977_v35 = vadd.f32 %v2387_v22, %v976_v34 }
0x17d2   :  { %980 = vrot.lane.b32.xlu0 %v977_v35, %s2269_s4  ;;  %v978_v39 = vmul.f32 %v977_v35, %v893_v24 }
0x1844   :  { %v981_v36 = vpop.permute.xlu0 %980 }
0x1845   :  { %v983_v38 = vmul.f32 %v981_v36, %v977_v35 }
0x1847   :  { %985 = vrot.lane.b32.xlu1 %v983_v38, %s2270_s27 }
0x18b9   :  { %v986_v40 = vpop.permute.xlu1 %985 }
0x18ba   :  { %v988_v41 = vadd.f32 %v986_v40, %v978_v39 }
0x18bc   :  { %2240 = vtanh.f32 %v988_v41 }
0x18c6   :  { %v2241_v42 = vpop.eup %2240 }
0x18c7   :  { %991 = vrot.lane.b32.xlu0 %v2241_v42, %s2269_s4 }
0x1939   :  { %v992_v43 = vpop.permute.xlu0 %991 }
0x193a   :  { %v994_v44 = vmul.f32 %v992_v43, %v977_v35 }
0x193c   :  { %996 = vrot.lane.b32.xlu1 %v994_v44, %s2270_s27 }
0x19ae   :  { %v2531_v45 = vpop.permute.xlu1 %996 }
0x19af   :  { %1988 = vmatmul.mubr.msk.f32.vlgmr.msra.gmra.mrb[10].mxu0 %vm141_vm2, %v2531_v45 }
0x19b0   :  { %2169 = vmatpush3.bf16.msra.mxu0 %v2339_v7  ;;  %2009 = vmatprep.mubr.msk.f32.mxu0 %vm2267_vm0, %v2268_v3 }
0x19b1   :  { %2170 = vmatprep.subr.bf16.mxu0 %v2266_v0 }
0x19b4   :  { %2172 = vmatpush3.bf16.msra.mxu0 %v2357_v11 }
0x19b5   :  { %2179 = vmatprep.subr.bf16.mxu0 %v2266_v0 }
0x1a82   :  { %v1066_v46 = vpop.f32.mrb[10].mxu0 }
0x1a83   :  { %v1067_v47 = vadd.f32 %v2376_v16, %v1066_v46  ;;  %v1989_v49 = vpop.f32.mrb[11].mxu0 }
0x1a85   :  { %2242 = vtanh.f32 %v1067_v47 }
0x1a8f   :  { %v2243_v50 = vpop.eup %2242 }
0x1a90   :  { %v1071_v51 = vmul.f32 %v2243_v50, %v2382_v20 }
0x1a92   :  { %v1072_v52 = vadd.f32 %v2387_v22, %v1071_v51 }
0x1a94   :  { %1075 = vrot.lane.b32.xlu0 %v1072_v52, %s2269_s4  ;;  %v1073_v56 = vmul.f32 %v1072_v52, %v988_v41 }
0x1b06   :  { %v1076_v54 = vpop.permute.xlu0 %1075 }
0x1b07   :  { %v1078_v55 = vmul.f32 %v1076_v54, %v1072_v52 }
0x1b09   :  { %1080 = vrot.lane.b32.xlu1 %v1078_v55, %s2270_s27 }
0x1b7b   :  { %v1081_v57 = vpop.permute.xlu1 %1080 }
0x1b7c   :  { %v1083_v58 = vadd.f32 %v1081_v57, %v1073_v56  ;;  %v1565_v57 = vld [vmem:[%s2774_s7] sm:$0xff] }
0x1b7e   :  { %2244 = vtanh.f32 %v1083_v58 }
0x1b88   :  { %v2245_v59 = vpop.eup %2244 }
0x1b89   :  { %1086 = vrot.lane.b32.xlu0 %v2245_v59, %s2269_s4 }
0x1bfb   :  { %v1087_v60 = vpop.permute.xlu0 %1086 }
0x1bfc   :  { %v1089_v61 = vmul.f32 %v1087_v60, %v1072_v52  ;;  %v1567_v60 = vld [vmem:[%s2774_s7 + $0x10] sm:$0xff] }
0x1bfe   :  { %1091 = vrot.lane.b32.xlu1 %v1089_v61, %s2270_s27  ;;  %v1568_v61 = vld [vmem:[%s2774_s7 + $0x18] sm:$0xff] }
0x1c70   :  { %v2548_v62 = vpop.permute.xlu1 %1091 }
0x1c71   :  { %1999 = vmatmul.mubr.msk.f32.vlgmr.msra.gmra.mrb[10].mxu1 %vm141_vm2, %v2548_v62 }
0x1c72   :  { %2175 = vmatpush3.bf16.msra.mxu1 %v2339_v7  ;;  %2020 = vmatprep.mubr.msk.f32.mxu1 %vm2267_vm0, %v2268_v3 }
0x1c73   :  { %2176 = vmatprep.subr.bf16.mxu1 %v2266_v0 }
0x1c76   :  { %2178 = vmatpush3.bf16.msra.mxu1 %v2357_v11 }
0x1c77   :  { %2185 = vmatprep.subr.bf16.mxu1 %v2266_v0 }
0x1d44   :  { %v1161_v1 = vpop.f32.mrb[10].mxu1 }
0x1d45   :  { %v1162_v2 = vadd.f32 %v2376_v16, %v1161_v1  ;;  %v2000_v4 = vpop.f32.mrb[11].mxu1 }
0x1d47   :  { %2246 = vtanh.f32 %v1162_v2  ;;  %v2621_v2 = vpack.c.bf16 %v1568_v61, %v1567_v60 }
0x1d51   :  { %v2247_v5 = vpop.eup %2246 }
0x1d52   :  { %v1166_v6 = vmul.f32 %v2247_v5, %v2382_v20 }
0x1d54   :  { %v1167_v9 = vadd.f32 %v2387_v22, %v1166_v6 }
0x1d56   :  { %1170 = vrot.lane.b32.xlu0 %v1167_v9, %s2269_s4  ;;  %v1168_v13 = vmul.f32 %v1167_v9, %v1083_v58  ;;  %v1566_v58 = vld [vmem:[%s2774_s7 + $0x8] sm:$0xff] }
0x1d57   :  { %v2608_v59 = vpack.c.bf16 %v1566_v58, %v1565_v57 }
0x1dc8   :  { %v1171_v10 = vpop.permute.xlu0 %1170 }
0x1dc9   :  { %v1173_v12 = vmul.f32 %v1171_v10, %v1167_v9 }
0x1dcb   :  { %1175 = vrot.lane.b32.xlu1 %v1173_v12, %s2270_s27 }
0x1e3d   :  { %v1176_v14 = vpop.permute.xlu1 %1175 }
0x1e3e   :  { %v1178_v15 = vadd.f32 %v1176_v14, %v1168_v13 }
0x1e40   :  { %2248 = vtanh.f32 %v1178_v15 }
0x1e4a   :  { %v2249_v17 = vpop.eup %2248 }
0x1e4b   :  { %1181 = vrot.lane.b32.xlu0 %v2249_v17, %s2269_s4 }
0x1ebd   :  { %v1182_v18 = vpop.permute.xlu0 %1181 }
0x1ebe   :  { %v1184_v21 = vmul.f32 %v1182_v18, %v1167_v9 }
0x1ec0   :  { %1186 = vrot.lane.b32.xlu1 %v1184_v21, %s2270_s27 }
0x1f32   :  { %v2565_v23 = vpop.permute.xlu1 %1186 }
0x1f33   :  { %2010 = vmatmul.mubr.msk.f32.vlgmr.msra.gmra.mrb[12].mxu0 %vm141_vm2, %v2565_v23 }
0x1f34   :  { %2181 = vmatpush3.bf16.msra.mxu0 %v2339_v7  ;;  %2031 = vmatprep.mubr.msk.f32.mxu0 %vm2267_vm0, %v2268_v3 }
0x1f35   :  { %2182 = vmatprep.subr.bf16.mxu0 %v2266_v0 }
0x1f38   :  { %2184 = vmatpush3.bf16.msra.mxu0 %v2357_v11 }
0x1f39   :  { %2191 = vmatprep.subr.bf16.mxu0 %v2266_v0 }
0x2006   :  { %v1256_v24 = vpop.f32.mrb[12].mxu0 }
0x2007   :  { %v1257_v25 = vadd.f32 %v2376_v16, %v1256_v24  ;;  %v2011_v26 = vpop.f32.mrb[13].mxu0 }
0x2009   :  { %2250 = vtanh.f32 %v1257_v25 }
0x2013   :  { %v2251_v27 = vpop.eup %2250 }
0x2014   :  { %v1261_v29 = vmul.f32 %v2251_v27, %v2382_v20 }
0x2016   :  { %v1262_v30 = vadd.f32 %v2387_v22, %v1261_v29 }
0x2018   :  { %1265 = vrot.lane.b32.xlu0 %v1262_v30, %s2269_s4  ;;  %v1263_v34 = vmul.f32 %v1262_v30, %v1178_v15 }
0x208a   :  { %v1266_v31 = vpop.permute.xlu0 %1265 }
0x208b   :  { %v1268_v32 = vmul.f32 %v1266_v31, %v1262_v30 }
0x208d   :  { %1270 = vrot.lane.b32.xlu1 %v1268_v32, %s2270_s27 }
0x20ff   :  { %v1271_v35 = vpop.permute.xlu1 %1270 }
0x2100   :  { %v1273_v36 = vadd.f32 %v1271_v35, %v1263_v34 }
0x2102   :  { %2252 = vtanh.f32 %v1273_v36 }
0x210c   :  { %v2253_v38 = vpop.eup %2252 }
0x210d   :  { %1276 = vrot.lane.b32.xlu0 %v2253_v38, %s2269_s4 }
0x217f   :  { %v1277_v39 = vpop.permute.xlu0 %1276 }
0x2180   :  { %v1279_v40 = vmul.f32 %v1277_v39, %v1262_v30 }
0x2182   :  { %1281 = vrot.lane.b32.xlu1 %v1279_v40, %s2270_s27 }
0x21f4   :  { %v2582_v41 = vpop.permute.xlu1 %1281 }
0x21f5   :  { %2021 = vmatmul.mubr.msk.f32.vlgmr.msra.gmra.mrb[12].mxu1 %vm141_vm2, %v2582_v41 }
0x21f6   :  { %2187 = vmatpush3.bf16.msra.mxu1 %v2339_v7  ;;  %2042 = vmatprep.mubr.msk.f32.mxu1 %vm2267_vm0, %v2268_v3 }
0x21f7   :  { %2188 = vmatprep.subr.bf16.mxu1 %v2266_v0 }
0x21fa   :  { %2190 = vmatpush3.bf16.msra.mxu1 %v2357_v11 }
0x21fb   :  { %2197 = vmatprep.subr.bf16.mxu1 %v2266_v0 }
0x22c8   :  { %v1351_v42 = vpop.f32.mrb[12].mxu1 }
0x22c9   :  { %v1352_v43 = vadd.f32 %v2376_v16, %v1351_v42  ;;  %v2022_v44 = vpop.f32.mrb[13].mxu1 }
0x22cb   :  { %2254 = vtanh.f32 %v1352_v43 }
0x22d5   :  { %v2255_v46 = vpop.eup %2254 }
0x22d6   :  { %v1356_v47 = vmul.f32 %v2255_v46, %v2382_v20 }
0x22d8   :  { %v1357_v49 = vadd.f32 %v2387_v22, %v1356_v47 }
0x22da   :  { %1360 = vrot.lane.b32.xlu0 %v1357_v49, %s2269_s4  ;;  %v1358_v51 = vmul.f32 %v1357_v49, %v1273_v36 }
0x234c   :  { %v1361_v7 = vpop.permute.xlu0 %1360 }
0x234d   :  { %v1363_v50 = vmul.f32 %v1361_v7, %v1357_v49 }
0x234f   :  { %1365 = vrot.lane.b32.xlu1 %v1363_v50, %s2270_s27 }
0x23c1   :  { %v1366_v11 = vpop.permute.xlu1 %1365 }
0x23c2   :  { %v2597_v52 = vadd.f32 %v1366_v11, %v1358_v51 }
0x23c4   :  { %2256 = vtanh.f32 %v2597_v52 }
0x23ce   :  { %v2257_v54 = vpop.eup %2256 }
0x23cf   :  { %1371 = vrot.lane.b32.xlu0 %v2257_v54, %s2269_s4 }
0x2441   :  { %v1372_v55 = vpop.permute.xlu0 %1371 }
0x2442   :  { %v1374_v56 = vmul.f32 %v1372_v55, %v1357_v49 }
0x2444   :  { %1376 = vrot.lane.b32.xlu1 %v1374_v56, %s2270_s27 }
0x24b6   :  { %v2616_v1 = vpop.permute.xlu1 %1376 }
0x24b7   :  { %2032 = vmatmul.mubr.msk.f32.vlgmr.msra.gmra.mrb[14].mxu0 %vm141_vm2, %v2616_v1 }
0x24b8   :  { %2193 = vmatpush3.bf16.msra.mxu0 %v2608_v59  ;;  %2053 = vmatprep.mubr.msk.f32.mxu0 %vm2267_vm0, %v2268_v3 }
0x24b9   :  { %2194 = vmatprep.subr.bf16.mxu0 %v2266_v0 }
0x24bc   :  { %2196 = vmatpush3.bf16.msra.mxu0 %v2621_v2 }
0x24bf   :  { %2054 = vmatmul.mubr.msk.f32.vlgmr.msra.gmra.mrb[16].mxu0 %vm141_vm2, %v2395_v33 }
0x24c0   :  { %2056 = vmatprep.mubr.msk.f32.mxu0 %vm2267_vm0, %v2268_v3 }
0x24c3   :  { %2057 = vmatmul.mubr.msk.f32.gmra.mrb[18].mxu0 %vm141_vm2, %v2412_v48 }
0x24c4   :  { %2059 = vmatprep.mubr.msk.f32.mxu0 %vm2267_vm0, %v2268_v3 }
0x24c7   :  { %2060 = vmatmul.mubr.msk.f32.gmra.mrb[20].mxu0 %vm141_vm2, %v2429_v63 }
0x24c8   :  { %2062 = vmatprep.mubr.msk.f32.mxu0 %vm2267_vm0, %v2268_v3 }
0x24cb   :  { %2063 = vmatmul.mubr.msk.f32.gmra.mrb[22].mxu0 %vm141_vm2, %v2446_v19  ;;  %v2661_v19 = vld [vmem:[%s2775_s8] ss:$0 sm:$0xff] }
0x24cc   :  { %2065 = vmatprep.mubr.msk.f32.mxu0 %vm2267_vm0, %v2268_v3 }
0x24cf   :  { %2066 = vmatmul.mubr.msk.f32.gmra.mrb[24].mxu0 %vm141_vm2, %v2463_v37 }
0x24d0   :  { %2068 = vmatprep.mubr.msk.f32.mxu0 %vm2267_vm0, %v2268_v3 }
0x24d3   :  { %2069 = vmatmul.mubr.msk.f32.gmra.mrb[26].mxu0 %vm141_vm2, %v2480_v53 }
0x24d4   :  { %2071 = vmatprep.mubr.msk.f32.mxu0 %vm2267_vm0, %v2268_v3 }
0x24d7   :  { %2072 = vmatmul.mubr.msk.f32.gmra.mrb[28].mxu0 %vm141_vm2, %v2497_v8 }
0x24d8   :  { %2074 = vmatprep.mubr.msk.f32.mxu0 %vm2267_vm0, %v2268_v3 }
0x24db   :  { %2075 = vmatmul.mubr.msk.f32.gmra.mrb[30].mxu0 %vm141_vm2, %v2514_v28 }
0x258a   :  { %v1446_v33 = vpop.f32.mrb[14].mxu0 }
0x258b   :  { %v1447_v48 = vadd.f32 %v2376_v16, %v1446_v33  ;;  %v2033_v63 = vpop.f32.mrb[15].mxu0 }
0x258d   :  { %2258 = vtanh.f32 %v1447_v48 }
0x2592   :  { %v1647_v37 = vpop.f32.mrb[16].mxu0 }
0x2593   :  { %v1648_v53 = vadd.f32 %v2661_v19, %v1647_v37  ;;  %v2055_v8 = vpop.f32.mrb[17].mxu0 }
0x2595   :  { %1721 = vst [vmem:[%s2776_s9] sm:$0xff] %v1648_v53 }
0x2596   :  { %v1652_v4 = vpop.f32.mrb[18].mxu0 }
0x2597   :  { %v2259_v28 = vpop.eup %2258  ;;  %v1653_v5 = vadd.f32 %v2661_v19, %v1652_v4  ;;  %v2058_v6 = vpop.f32.mrb[19].mxu0 }
0x2598   :  { %v1451_v9 = vmul.f32 %v2259_v28, %v2382_v20 }
0x2599   :  { %1722 = vst [vmem:[%s2776_s9 + $0x8] sm:$0xff] %v1653_v5 }
0x259a   :  { %v1657_v10 = vpop.f32.mrb[20].mxu0  ;;  %v1452_v12 = vadd.f32 %v2387_v22, %v1451_v9 }
0x259b   :  { %v1658_v13 = vadd.f32 %v2661_v19, %v1657_v10  ;;  %v2061_v14 = vpop.f32.mrb[21].mxu0 }
0x259c   :  { %1455 = vrot.lane.b32.xlu0 %v1452_v12, %s2269_s4  ;;  %v1453_v40 = vmul.f32 %v1452_v12, %v2597_v52 }
0x259d   :  { %1723 = vst [vmem:[%s2776_s9 + $0x10] sm:$0xff] %v1658_v13 }
0x259e   :  { %v1662_v15 = vpop.f32.mrb[22].mxu0 }
0x259f   :  { %v1663_v17 = vadd.f32 %v2661_v19, %v1662_v15  ;;  %v2064_v18 = vpop.f32.mrb[23].mxu0 }
0x25a1   :  { %1724 = vst [vmem:[%s2776_s9 + $0x18] sm:$0xff] %v1663_v17 }
0x25a2   :  { %v1667_v21 = vpop.f32.mrb[24].mxu0 }
0x25a3   :  { %v1668_v24 = vadd.f32 %v2661_v19, %v1667_v21  ;;  %v2067_v25 = vpop.f32.mrb[25].mxu0 }
0x25a5   :  { %1725 = vst [vmem:[%s2776_s9 + $0x20] sm:$0xff] %v1668_v24 }
0x25a6   :  { %v1672_v26 = vpop.f32.mrb[26].mxu0 }
0x25a7   :  { %v1673_v27 = vadd.f32 %v2661_v19, %v1672_v26  ;;  %v2070_v29 = vpop.f32.mrb[27].mxu0 }
0x25a9   :  { %1726 = vst [vmem:[%s2776_s9 + $0x28] sm:$0xff] %v1673_v27 }
0x25aa   :  { %v1677_v30 = vpop.f32.mrb[28].mxu0 }
0x25ab   :  { %v1678_v31 = vadd.f32 %v2661_v19, %v1677_v30  ;;  %v2073_v32 = vpop.f32.mrb[29].mxu0 }
0x25ad   :  { %1727 = vst [vmem:[%s2776_s9 + $0x30] sm:$0xff] %v1678_v31 }
0x25ae   :  { %v1682_v34 = vpop.f32.mrb[30].mxu0 }
0x25af   :  { %v1683_v35 = vadd.f32 %v2661_v19, %v1682_v34  ;;  %v2076_v36 = vpop.f32.mrb[31].mxu0 }
0x25b1   :  { %1728 = vst [vmem:[%s2776_s9 + $0x38] sm:$0xff] %v1683_v35 }
0x260e   :  { %v1456_v38 = vpop.permute.xlu0 %1455 }
0x260f   :  { %v1458_v39 = vmul.f32 %v1456_v38, %v1452_v12 }
0x2611   :  { %1460 = vrot.lane.b32.xlu1 %v1458_v39, %s2270_s27 }
0x2683   :  { %v1461_v42 = vpop.permute.xlu1 %1460 }
0x2684   :  { %v1463_v43 = vadd.f32 %v1461_v42, %v1453_v40 }
0x2686   :  { %2260 = vtanh.f32 %v1463_v43 }
0x2690   :  { %v2261_v44 = vpop.eup %2260 }
0x2691   :  { %1466 = vrot.lane.b32.xlu0 %v2261_v44, %s2269_s4 }
0x2703   :  { %v1467_v46 = vpop.permute.xlu0 %1466 }
0x2704   :  { %v1469_v47 = vmul.f32 %v1467_v46, %v1452_v12 }
0x2706   :  { %1471 = vrot.lane.b32.xlu1 %v1469_v47, %s2270_s27 }
0x2778   :  { %v1472_v49 = vpop.permute.xlu1 %1471 }
0x2779   :  { %2043 = vmatmul.mubr.msk.f32.vlgmr.msra.gmra.mrb[14].mxu1 %vm141_vm2, %v1472_v49 }
0x277a   :  { %2199 = vmatpush3.bf16.msra.mxu1 %v2608_v59  ;;  %2077 = vmatprep.mubr.msk.f32.mxu1 %vm2267_vm0, %v2268_v3 }
0x277b   :  { %2198 = vmatprep.subr.bf16.mxu1 %v2266_v0 }
0x277e   :  { %2200 = vmatpush3.bf16.msra.mxu1 %v2621_v2 }
0x2781   :  { %2078 = vmatmul.mubr.msk.f32.vlgmr.msra.gmra.mrb[16].mxu1 %vm141_vm2, %v2531_v45 }
0x2782   :  { %2080 = vmatprep.mubr.msk.f32.mxu1 %vm2267_vm0, %v2268_v3 }
0x2785   :  { %2081 = vmatmul.mubr.msk.f32.gmra.mrb[18].mxu1 %vm141_vm2, %v2548_v62 }
0x2786   :  { %2083 = vmatprep.mubr.msk.f32.mxu1 %vm2267_vm0, %v2268_v3 }
0x2789   :  { %2084 = vmatmul.mubr.msk.f32.gmra.mrb[20].mxu1 %vm141_vm2, %v2565_v23 }
0x278a   :  { %2086 = vmatprep.mubr.msk.f32.mxu1 %vm2267_vm0, %v2268_v3 }
0x278d   :  { %2087 = vmatmul.mubr.msk.f32.gmra.mrb[22].mxu1 %vm141_vm2, %v2582_v41 }
0x278e   :  { %2089 = vmatprep.mubr.msk.f32.mxu1 %vm2267_vm0, %v2268_v3 }
0x2791   :  { %2090 = vmatmul.mubr.msk.f32.gmra.mrb[24].mxu1 %vm141_vm2, %v2616_v1 }
0x2792   :  { %2092 = vmatprep.mubr.msk.f32.mxu1 %vm2267_vm0, %v2268_v3 }
0x2795   :  { %2093 = vmatmul.mubr.msk.f32.gmra.mrb[26].mxu1 %vm141_vm2, %v1472_v49 }
0x2796   :  { %2095 = vmatprep.mubr.msk.f32.mxu1 %vm2267_vm0, %v2268_v3 }
0x284c   :  { %v1541_v0 = vpop.f32.mrb[14].mxu1 }
0x284d   :  { %v1542_v45 = vadd.f32 %v2376_v16, %v1541_v0  ;;  %v2044_v62 = vpop.f32.mrb[15].mxu1 }
0x284f   :  { %2262 = vtanh.f32 %v1542_v45 }
0x2854   :  { %v1687_v23 = vpop.f32.mrb[16].mxu1 }
0x2855   :  { %v1688_v41 = vadd.f32 %v2661_v19, %v1687_v23  ;;  %v2079_v7 = vpop.f32.mrb[17].mxu1 }
0x2857   :  { %1729 = vst [vmem:[%s2776_s9 + $0x40] sm:$0xff] %v1688_v41 }
0x2858   :  { %v1692_v50 = vpop.f32.mrb[18].mxu1 }
0x2859   :  { %v2263_v51 = vpop.eup %2262  ;;  %v1693_v11 = vadd.f32 %v2661_v19, %v1692_v50  ;;  %v2082_v52 = vpop.f32.mrb[19].mxu1 }
0x285a   :  { %v1546_v3 = vmul.f32 %v2263_v51, %v2382_v20 }
0x285b   :  { %1730 = vst [vmem:[%s2776_s9 + $0x48] sm:$0xff] %v1693_v11 }
0x285c   :  { %v1697_v16 = vpop.f32.mrb[20].mxu1  ;;  %v1547_v54 = vadd.f32 %v2387_v22, %v1546_v3 }
0x285d   :  { %v1698_v55 = vadd.f32 %v2661_v19, %v1697_v16  ;;  %v2085_v56 = vpop.f32.mrb[21].mxu1 }
0x285e   :  { %1550 = vrot.lane.b32.xlu0 %v1547_v54, %s2269_s4  ;;  %v1548_v63 = vmul.f32 %v1547_v54, %v1463_v43 }
0x285f   :  { %1731 = vst [vmem:[%s2776_s9 + $0x50] sm:$0xff] %v1698_v55 }
0x2860   :  { %v1702_v57 = vpop.f32.mrb[22].mxu1 }
0x2861   :  { %v1703_v58 = vadd.f32 %v2661_v19, %v1702_v57  ;;  %v2088_v20 = vpop.f32.mrb[23].mxu1 }
0x2863   :  { %1732 = vst [vmem:[%s2776_s9 + $0x58] sm:$0xff] %v1703_v58 }
0x2864   :  { %v1707_v59 = vpop.f32.mrb[24].mxu1 }
0x2865   :  { %v1708_v22 = vadd.f32 %v2661_v19, %v1707_v59  ;;  %v2091_v60 = vpop.f32.mrb[25].mxu1 }
0x2867   :  { %1733 = vst [vmem:[%s2776_s9 + $0x60] sm:$0xff] %v1708_v22 }
0x2868   :  { %v1712_v61 = vpop.f32.mrb[26].mxu1 }
0x2869   :  { %v1713_v1 = vadd.f32 %v2661_v19, %v1712_v61  ;;  %v2094_v2 = vpop.f32.mrb[27].mxu1 }
0x286b   :  { %1734 = vst [vmem:[%s2776_s9 + $0x68] sm:$0xff] %v1713_v1 }
0x28d0   :  { %v1551_v33 = vpop.permute.xlu0 %1550 }
0x28d1   :  { %v1553_v48 = vmul.f32 %v1551_v33, %v1547_v54 }
0x28d3   :  { %1555 = vrot.lane.b32.xlu1 %v1553_v48, %s2270_s27 }
0x2945   :  { %v1556_v37 = vpop.permute.xlu1 %1555 }
0x2946   :  { %v1558_v53 = vadd.f32 %v1556_v37, %v1548_v63 }
0x2948   :  { %2264 = vtanh.f32 %v1558_v53 }
0x2952   :  { %v2265_v8 = vpop.eup %2264 }
0x2953   :  { %1561 = vrot.lane.b32.xlu0 %v2265_v8, %s2269_s4 }
0x29c5   :  { %v1562_v4 = vpop.permute.xlu0 %1561 }
0x29c6   :  { %v1564_v28 = vmul.f32 %v1562_v4, %v1547_v54 }
0x29c8   :  { %1577 = vrot.lane.b32.xlu1 %v1564_v28, %s2270_s27 }
0x2a3a   :  { %v1578_v5 = vpop.permute.xlu1 %1577 }
0x2a3b   :  { %2096 = vmatmul.mubr.msk.f32.gmra.mrb[28].mxu1 %vm141_vm2, %v1578_v5 }
0x2b0e   :  { %v1717_v6 = vpop.f32.mrb[28].mxu1 }
0x2b0f   :  { %v1718_v9 = vadd.f32 %v2661_v19, %v1717_v6  ;;  %v2097_v10 = vpop.f32.mrb[29].mxu1 }
0x2b11   :  { %1735 = vst [vmem:[%s2776_s9 + $0x70] sm:$0xff] %v1718_v9 }

</bundles_post_ra>
